<compile_context>
chip_gen: v7x
topology: tpu7x:2x2x1
jax: 0.10.0
libtpu: 0.0.40
codegen_flags: <defaults>
</compile_context>

<pallas_src>
import jax
import jax.numpy as jnp
from jax.experimental import pallas as pl
from jax.experimental.pallas import tpu as pltpu

LANE = 128


def _round_up(x, m):
    return (x + m - 1) // m * m


def _vmem_capacity_bytes():
    """Per-core VMEM capacity; conservative 64 MiB (v7x) fallback."""
    try:
        cap = getattr(pltpu.get_tpu_info(), "vmem_capacity_bytes", None)
        if cap:
            return int(cap)
    except Exception:
        pass
    return 64 * 1024 * 1024


def _choose_tiles(B, S, F, itemsize, x_budget):
    """Pick (TB, TS) with TB | B and TS | S (no wrapper-side padding), blocks
    legal under Mosaic's (8,128) rule (second-to-last block dims must be a
    multiple of 8 or the full dim), and the x tile within the VMEM budget."""
    tb_cands = [d for d in range(B, 0, -1) if B % d == 0 and (d == B or d % 8 == 0)]
    ts_cands = [d for d in range(S, 0, -1) if S % d == 0 and (d == S or d % 8 == 0)]

    def tile(tb, ts):
        return tb * ts * F * itemsize

    pairs = [(tb, ts) for tb in tb_cands for ts in ts_cands]
    fitting = [p for p in pairs if tile(*p) <= x_budget]
    if not fitting:
        # Nothing fits the budget: take the smallest legal tile and size
        # vmem_limit from it.  TODO(synk): masked/BoundedSlice tail for
        # awkward (prime-ish) S at huge F.
        return min(pairs, key=lambda p: tile(*p))

    def score(p):
        tb, ts = p
        nb, ns = B // tb, S // ts
        return (
            nb >= 2,          # batch axis shardable across 2 TCs (v7x megacore)
            nb * ns >= 4,     # >=2 steps per core so DMA/compute pipeline
            tile(tb, ts),     # then: biggest tile (HBM roofline)
            ts,               # then: longest S chunk (fewest accumulator passes)
        )

    return max(fitting, key=score)


def _text_emb_kernel(x_ref, m_ref, w_ref, b_ref, o_ref, num_acc, msum_acc):
    """One (TB, TS) slab of the masked pooling; projection on the last S step.

    x_ref: (TB, TS, F)   token features (f32 or bf16)
    m_ref: (TB, TS, 1)   attention mask, same dtype as x (0/1 exact in bf16)
    w_ref: (F, O_pad)    fc weight (output dim padded to a lane multiple)
    b_ref: (1, O_pad)    fc bias (padded)
    o_ref: (TB, O_pad)   pooled embeddings (lane-dense f32 store)
    num_acc : (TB, F)  f32 VMEM accumulator of sum_s m_s x_s
    msum_acc: (TB, 1)  f32 VMEM accumulator of sum_s m_s
    """
    j = pl.program_id(1)

    @pl.when(j == 0)
    def _init():
        num_acc[...] = jnp.zeros_like(num_acc)
        msum_acc[...] = jnp.zeros_like(msum_acc)

    x = x_ref[...]                                   # (TB, TS, F)
    m = m_ref[...]                                   # (TB, TS, 1)
    # Mask multiply in the input dtype (bf16 VPU on v6e/v7x), accumulate in f32.
    xm = (x * m).astype(jnp.float32)
    num_acc[...] += jnp.sum(xm, axis=1)                          # (TB, F)
    msum_acc[...] += jnp.sum(m.astype(jnp.float32), axis=1)      # (TB, 1)

    @pl.when(j == pl.num_programs(1) - 1)
    def _finalize():
        m_sum = msum_acc[...]                                     # (TB, 1)
        # Reciprocal once per row, then cheap VPU multiplies (exact, keeps 1e-5).
        inv = 1.0 / jnp.maximum(m_sum, jnp.float32(1e-9))         # (TB, 1)
        # Single pooled projection on the MXU.  bf16 weights -> native bf16
        # matmul; f32 weights -> exact (HIGHEST) f32 matmul.
        lhs = num_acc[...].astype(w_ref.dtype)
        prec = (jax.lax.Precision.HIGHEST if w_ref.dtype == jnp.float32
                else jax.lax.Precision.DEFAULT)
        proj = jnp.dot(lhs, w_ref[...], precision=prec,
                       preferred_element_type=jnp.float32)        # (TB, O_pad)
        bias = b_ref[...].astype(jnp.float32)
        o_ref[...] = ((proj + bias * m_sum) * inv).astype(o_ref.dtype)


def text_output_to_embedding(sequence_output, attention_mask, w, b):
    """sequence_output: (B, S, F) [f32 or bf16], attention_mask: (B, S),
    w: (F, O), b: (O,)  ->  (B, O) float32."""
    B, S, F = sequence_output.shape
    O = w.shape[1]
    x_dtype = sequence_output.dtype
    itemsize = jnp.dtype(x_dtype).itemsize

    # Pad only the (tiny) weight/bias output dim so stores & weight lanes are
    # 128-dense; the big (B,S,F) tensor is never padded or copied.
    O_pad = _round_up(O, LANE)
    w_p = jnp.pad(w, ((0, 0), (0, O_pad - O)))
    b_p = jnp.pad(b, (0, O_pad - O)).reshape(1, O_pad)
    w_itemsize = jnp.dtype(w_p.dtype).itemsize

    # Mask as (B, S, 1): S on the sublane axis (matches x), lane splat across F.
    mask = attention_mask.reshape(B, S, 1).astype(x_dtype)

    # Per-generation tile budget from actual VMEM capacity.
    vmem_cap = _vmem_capacity_bytes()
    x_budget = max(1 << 20, min(8 << 20, vmem_cap // 16))
    TB, TS = _choose_tiles(B, S, F, itemsize, x_budget)
    nb, ns = B // TB, S // TS

    # Scoped-VMEM budget: double-buffered tiles + (double-buffered) resident
    # weights + f32 intermediates of the masked sum + accumulators + fudge.
    x_tile = TB * TS * F * itemsize
    m_tile = TB * TS * itemsize
    o_tile = TB * O_pad * 4
    w_bytes = (F * O_pad + O_pad) * w_itemsize
    acc_bytes = TB * F * 4 + TB * LANE * 4
    interm = TB * TS * F * (itemsize + 4)            # x*m + its f32 upcast
    total = (2 * (x_tile + m_tile + o_tile) + 2 * w_bytes
             + acc_bytes + interm + (2 << 20))
    vmem_limit = min(max(total, 16 << 20), int(vmem_cap * 0.9))
    vmem_limit = int(max(vmem_limit, 4 << 20))

    out = pl.pallas_call(
        _text_emb_kernel,
        out_shape=jax.ShapeDtypeStruct((B, O_pad), jnp.float32),
        grid_spec=pltpu.PrefetchScalarGridSpec(
            num_scalar_prefetch=0,
            grid=(nb, ns),
            in_specs=[
                pl.BlockSpec((TB, TS, F), lambda i, j: (i, j, 0)),
                pl.BlockSpec((TB, TS, 1), lambda i, j: (i, j, 0)),
                pl.BlockSpec((F, O_pad), lambda i, j: (0, 0)),
                pl.BlockSpec((1, O_pad), lambda i, j: (0, 0)),
            ],
            out_specs=pl.BlockSpec((TB, O_pad), lambda i, j: (i, 0)),
            scratch_shapes=[
                pltpu.VMEM((TB, F), jnp.float32),
                pltpu.VMEM((TB, 1), jnp.float32),
            ],
        ),
        compiler_params=pltpu.CompilerParams(
            dimension_semantics=("parallel", "arbitrary"),
            vmem_limit_bytes=vmem_limit,
        ),
    )(sequence_output, mask, w_p, b_p)

    return out[:, :O]


def text_model_forward(sequence_output, attention_mask, params):
    """Equivalent of TextModel.forward AFTER the backbone: returns txt_emb.
    # TODO(synk): when feature_dim == out_dim the PyTorch module uses
    # nn.Identity for fc; that case is just the masked mean-pool (no matmul)."""
    txt_emb = text_output_to_embedding(
        sequence_output, attention_mask, params["fc_w"], params["fc_b"])
    return {"txt_emb": txt_emb}


def init_params(key, feature_dim, out_dim):
    # nn.Linear default init: U(-1/sqrt(fan_in), 1/sqrt(fan_in))
    kw, kb = jax.random.split(key)
    bound = 1.0 / (feature_dim ** 0.5)
    w = jax.random.uniform(kw, (feature_dim, out_dim), jnp.float32,
                           minval=-bound, maxval=bound)
    b = jax.random.uniform(kb, (out_dim,), jnp.float32,
                           minval=-bound, maxval=bound)
    return {"fc_w": w, "fc_b": b}


if __name__ == "__main__":
    # Small shapes consistent with the module: feature_dim != out_dim so the
    # fc Linear path is exercised (feature_dim == out_dim would be Identity).
    B, S, FEAT, OUT = 2, 8, 32, 16

    key = jax.random.PRNGKey(0)
    k_seq, k_param = jax.random.split(key)

    # Stand-in for `self.model(**tokens)[0]` (sequence_output).
    sequence_output = jax.random.normal(k_seq, (B, S, FEAT), jnp.float32)
    # Ragged attention mask like a padded batch: lengths 8 and 5.
    attention_mask = jnp.array(
        [[1, 1, 1, 1, 1, 1, 1, 1],
         [1, 1, 1, 1, 1, 0, 0, 0]], dtype=jnp.float32)

    params = init_params(k_param, FEAT, OUT)

    # --- f32 path: exact match to the PyTorch reference math ---
    out = text_model_forward(sequence_output, attention_mask, params)
    txt_emb = jax.block_until_ready(out["txt_emb"])

    proj = jnp.einsum("bsf,fo->bso", sequence_output, params["fc_w"],
                      precision=jax.lax.Precision.HIGHEST) + params["fc_b"]
    m = attention_mask[..., None]
    ref = (proj * m).sum(axis=1) / jnp.maximum(m.sum(axis=1), 1e-9)
    assert txt_emb.shape == (B, OUT)
    err = float(jnp.max(jnp.abs(txt_emb - ref)))
    assert jnp.allclose(txt_emb, ref, atol=1e-5, rtol=1e-5), err

    # --- bf16 ingestion path (halves HBM traffic; f32 accumulation inside) ---
    seq_bf16 = sequence_output.astype(jnp.bfloat16)
    params_bf16 = {"fc_w": params["fc_w"].astype(jnp.bfloat16),
                   "fc_b": params["fc_b"].astype(jnp.bfloat16)}
    out_bf16 = text_model_forward(seq_bf16, attention_mask, params_bf16)
    emb_bf16 = jax.block_until_ready(out_bf16["txt_emb"])
    assert emb_bf16.shape == (B, OUT)
    assert jnp.allclose(emb_bf16, ref, atol=5e-2, rtol=5e-2)

    print("KERNEL_OK")
</pallas_src>

<mosaic_0001>
module attributes {stable_mosaic.version = 11 : i64} {
  func.func @_text_emb_kernel(%arg0: i32, %arg1: i32, %arg2: memref<2x8x32xf32, #tpu.memory_space<vmem>>, %arg3: memref<2x8x1xf32, #tpu.memory_space<vmem>>, %arg4: memref<32x128xf32, #tpu.memory_space<vmem>>, %arg5: memref<1x128xf32, #tpu.memory_space<vmem>>, %arg6: memref<2x128xf32, #tpu.memory_space<vmem>>, %arg7: memref<2x32xf32, #tpu.memory_space<vmem>>, %arg8: memref<2x1xf32, #tpu.memory_space<vmem>>) attributes {dimension_semantics = [#tpu.dimension_semantics<parallel>, #tpu.dimension_semantics<arbitrary>], iteration_bounds = array<i64: 1, 1>, scalar_prefetch = 0 : i64, scratch_operands = 2 : i64, tpu.core_type = #tpu.core_type<tc>, window_params = [{transform_indices = @transform_0, window_bounds = array<i64: 2, 8, 32>}, {transform_indices = @transform_1, window_bounds = array<i64: 2, 8, 1>}, {pipeline_mode = #tpu.pipeline_mode<synchronous>, transform_indices = @transform_2, window_bounds = array<i64: 32, 128>}, {pipeline_mode = #tpu.pipeline_mode<synchronous>, transform_indices = @transform_3, window_bounds = array<i64: 1, 128>}, {transform_indices = @transform_4, window_bounds = array<i64: 2, 128>}]} {
    %c0_i32 = arith.constant 0 : i32
    %0 = arith.cmpi eq, %arg1, %c0_i32 : i32
    %1 = arith.extui %0 : i1 to i32
    %c0_i32_0 = arith.constant 0 : i32
    %2 = arith.cmpi ne, %1, %c0_i32_0 : i32
    scf.if %2 {
      %cst_17 = arith.constant 0.000000e+00 : f32
      %18 = vector.broadcast %cst_17 : f32 to vector<2x32xf32>
      %c0_18 = arith.constant 0 : index
      %c0_19 = arith.constant 0 : index
      %19 = vector.load %arg7[%c0_18, %c0_19] : memref<2x32xf32, #tpu.memory_space<vmem>>, vector<2x32xf32>
      tpu.vector_store %arg7[%c0_18, %c0_19], %18 {strides = array<i32>} : memref<2x32xf32, #tpu.memory_space<vmem>>, vector<2x32xf32>,
      %cst_20 = arith.constant 0.000000e+00 : f32
      %20 = vector.broadcast %cst_20 : f32 to vector<2x1xf32>
      %c0_21 = arith.constant 0 : index
      %c0_22 = arith.constant 0 : index
      %21 = vector.load %arg8[%c0_21, %c0_22] : memref<2x1xf32, #tpu.memory_space<vmem>>, vector<2x1xf32>
      tpu.vector_store %arg8[%c0_21, %c0_22], %20 {strides = array<i32>} : memref<2x1xf32, #tpu.memory_space<vmem>>, vector<2x1xf32>,
    } else {
    }
    %c0 = arith.constant 0 : index
    %c0_1 = arith.constant 0 : index
    %c0_2 = arith.constant 0 : index
    %3 = vector.load %arg2[%c0, %c0_1, %c0_2] : memref<2x8x32xf32, #tpu.memory_space<vmem>>, vector<2x8x32xf32>
    %c0_3 = arith.constant 0 : index
    %c0_4 = arith.constant 0 : index
    %c0_5 = arith.constant 0 : index
    %4 = vector.load %arg3[%c0_3, %c0_4, %c0_5] : memref<2x8x1xf32, #tpu.memory_space<vmem>>, vector<2x8x1xf32>
    %5 = vector.broadcast %4 : vector<2x8x1xf32> to vector<2x8x32xf32>
    %6 = arith.mulf %3, %5 : vector<2x8x32xf32>
    %c0_6 = arith.constant 0 : index
    %c0_7 = arith.constant 0 : index
    %7 = vector.load %arg7[%c0_6, %c0_7] : memref<2x32xf32, #tpu.memory_space<vmem>>, vector<2x32xf32>
    %cst = arith.constant dense<0.000000e+00> : vector<2x32xf32>
    %8 = vector.multi_reduction <add>, %6, %cst [1] : vector<2x8x32xf32> to vector<2x32xf32>
    %9 = arith.addf %7, %8 : vector<2x32xf32>
    %c0_8 = arith.constant 0 : index
    %c0_9 = arith.constant 0 : index
    %10 = vector.load %arg7[%c0_8, %c0_9] : memref<2x32xf32, #tpu.memory_space<vmem>>, vector<2x32xf32>
    tpu.vector_store %arg7[%c0_8, %c0_9], %9 {strides = array<i32>} : memref<2x32xf32, #tpu.memory_space<vmem>>, vector<2x32xf32>,
    %c0_10 = arith.constant 0 : index
    %c0_11 = arith.constant 0 : index
    %11 = vector.load %arg8[%c0_10, %c0_11] : memref<2x1xf32, #tpu.memory_space<vmem>>, vector<2x1xf32>
    %cst_12 = arith.constant dense<0.000000e+00> : vector<2x1xf32>
    %12 = vector.multi_reduction <add>, %4, %cst_12 [1] : vector<2x8x1xf32> to vector<2x1xf32>
    %13 = arith.addf %11, %12 : vector<2x1xf32>
    %c0_13 = arith.constant 0 : index
    %c0_14 = arith.constant 0 : index
    %14 = vector.load %arg8[%c0_13, %c0_14] : memref<2x1xf32, #tpu.memory_space<vmem>>, vector<2x1xf32>
    tpu.vector_store %arg8[%c0_13, %c0_14], %13 {strides = array<i32>} : memref<2x1xf32, #tpu.memory_space<vmem>>, vector<2x1xf32>,
    %c0_i32_15 = arith.constant 0 : i32
    %15 = arith.cmpi eq, %arg1, %c0_i32_15 : i32
    %16 = arith.extui %15 : i1 to i32
    %c0_i32_16 = arith.constant 0 : i32
    %17 = arith.cmpi ne, %16, %c0_i32_16 : i32
    scf.if %17 {
      %c0_17 = arith.constant 0 : index
      %c0_18 = arith.constant 0 : index
      %18 = vector.load %arg8[%c0_17, %c0_18] : memref<2x1xf32, #tpu.memory_space<vmem>>, vector<2x1xf32>
      %cst_19 = arith.constant 9.99999971E-10 : f32
      %19 = vector.broadcast %cst_19 : f32 to vector<2x1xf32>
      %20 = arith.maximumf %18, %19 : vector<2x1xf32>
      %cst_20 = arith.constant 1.000000e+00 : f32
      %21 = vector.broadcast %cst_20 : f32 to vector<2x1xf32>
      %22 = arith.divf %21, %20 : vector<2x1xf32>
      %c0_21 = arith.constant 0 : index
      %c0_22 = arith.constant 0 : index
      %23 = vector.load %arg7[%c0_21, %c0_22] : memref<2x32xf32, #tpu.memory_space<vmem>>, vector<2x32xf32>
      %c0_23 = arith.constant 0 : index
      %c0_24 = arith.constant 0 : index
      %24 = vector.load %arg4[%c0_23, %c0_24] : memref<32x128xf32, #tpu.memory_space<vmem>>, vector<32x128xf32>
      %cst_25 = arith.constant dense<0.000000e+00> : vector<2x128xf32>
      %25 = tpu.matmul %23, %24, %cst_25 {dimension_numbers = #tpu.dot_dimension_numbers<[1], [0], [0], [1], [0, 0, 1, 1], [], []>, precision = #tpu.contract_precision<fp32>} : vector<2x32xf32>, vector<32x128xf32>, vector<2x128xf32> -> vector<2x128xf32>
      %c0_26 = arith.constant 0 : index
      %c0_27 = arith.constant 0 : index
      %26 = vector.load %arg5[%c0_26, %c0_27] : memref<1x128xf32, #tpu.memory_space<vmem>>, vector<1x128xf32>
      %27 = vector.broadcast %26 : vector<1x128xf32> to vector<2x128xf32>
      %28 = vector.broadcast %18 : vector<2x1xf32> to vector<2x128xf32>
      %29 = arith.mulf %27, %28 : vector<2x128xf32>
      %30 = arith.addf %25, %29 : vector<2x128xf32>
      %31 = vector.broadcast %22 : vector<2x1xf32> to vector<2x128xf32>
      %32 = arith.mulf %30, %31 : vector<2x128xf32>
      %c0_28 = arith.constant 0 : index
      %c0_29 = arith.constant 0 : index
      %33 = vector.load %arg6[%c0_28, %c0_29] : memref<2x128xf32, #tpu.memory_space<vmem>>, vector<2x128xf32>
      tpu.vector_store %arg6[%c0_28, %c0_29], %32 {strides = array<i32>} : memref<2x128xf32, #tpu.memory_space<vmem>>, vector<2x128xf32>,
    } else {
    }
    return
  }
  func.func @transform_0(%arg0: i32, %arg1: i32) -> (i32, i32, i32) {
    %c0_i32 = arith.constant 0 : i32
    %c0_i32_0 = arith.constant 0 : i32
    return %arg0, %arg1, %c0_i32 : i32, i32, i32
  }
  func.func @transform_1(%arg0: i32, %arg1: i32) -> (i32, i32, i32) {
    %c0_i32 = arith.constant 0 : i32
    %c0_i32_0 = arith.constant 0 : i32
    return %arg0, %arg1, %c0_i32 : i32, i32, i32
  }
  func.func @transform_2(%arg0: i32, %arg1: i32) -> (i32, i32) {
    %c0_i32 = arith.constant 0 : i32
    %c0_i32_0 = arith.constant 0 : i32
    %c0_i32_1 = arith.constant 0 : i32
    return %c0_i32, %c0_i32_0 : i32, i32
  }
  func.func @transform_3(%arg0: i32, %arg1: i32) -> (i32, i32) {
    %c0_i32 = arith.constant 0 : i32
    %c0_i32_0 = arith.constant 0 : i32
    %c0_i32_1 = arith.constant 0 : i32
    return %c0_i32, %c0_i32_0 : i32, i32
  }
  func.func @transform_4(%arg0: i32, %arg1: i32) -> (i32, i32) {
    %c0_i32 = arith.constant 0 : i32
    %c0_i32_0 = arith.constant 0 : i32
    return %arg0, %c0_i32 : i32, i32
  }
}

</mosaic_0001>

<bundles_post_ra>
// kernel: tpu_custom_call.1
= control target key start
LH: loop header
LB: loop body
LE: loop exit
PB: predicated region body
PF: predicated region fallthrough
CT: control target
= control target key end

     0   :  { %9 = vsyncpa [#allocation5], 0  ;;  %s978_s0 = inlined_call_operand.vmem [shape: f32[2,8,32], index: 0, kind: input, shape index: {}]   ;;  %s979_s1 = inlined_call_operand.vmem [shape: f32[2,8,1], index: 1, kind: input, shape index: {}]   ;;  %s980_s2 = inlined_call_operand.hbm [shape: f32[32,128], index: 2, kind: input, shape index: {}]   ;;  %s981_s3 = inlined_call_operand.vmem [shape: f32[1,128], index: 3, kind: input, shape index: {}]   ;;  %s982_s4 = inlined_call_operand.hbm [shape: f32[2,128], index: 4, kind: output, shape index: {}]  }
   0x1   :  { %10 = vsyncpa [#allocation6], 0  ;;  %s841_s15 = smov [#allocation4]   ;;  %s793_s19 = scalar_lea.hbm %s980_s2, 512 }
   0x2   :  { %s20_s16 = sshll.u32 %s841_s15, 4  ;;  %p794_p0 = scmp.ne.s32.totalorder %s980_s2, %s793_s19  ;;  %s21_s16 = int_to_ptr.vmem [resolvable:$true] %s20_s16 }
   0x3   :  { %p797_p1 = scmp.lt.u32.totalorder %s793_s19, %s980_s2 }
   0x5   :  { %p799_p2 = pnand %p797_p1, %p794_p0 }
   0x7   :  { %802 = shalt.err (!%p799_p2)
}
   0x8   :  { %s803_s24 = scalar_lea.vmem %s21_s16, 512  ;;  %p808_p4 = scmp.lt.s32.totalorder %s21_s16, %s21_s16 }
   0x9   :  { %p804_p3 = scmp.ne.s32.totalorder %s21_s16, %s803_s24  ;;  %p809_p5 = scmp.lt.s32.totalorder %s803_s24, %s803_s24 }
   0xb   :  { %p810_p6 = por %p809_p5, %p808_p4 }
   0xd   :  { %p811_p7 = pnand %p810_p6, %p804_p3 }
   0xf   :  { %814 = shalt.err (!%p811_p7)
}
  0x10   :  { %s842_s25 = smov 128   ;;  %s843_s26 = smov 8  }
  0x11   :  { %26 = dma.hbm_to_vmem [thread:$0]  %s980_s2, 512, %s21_s16, [#allocation5], %s842_s25, %s842_s25, %s843_s26  }
  0x12   :  { %837 = dma.done.wait [#allocation5], 512  }
  0x13   :  { %838 = vsyncadd [#allocation5], 4294966784  ;;  %vm38_vm0 = vcmask 1024   ;;  %v844_v0 = vmov 0   ;;  %v845_v1 = vmov 0.0   ;;  %vm81_vm1 = vcmask 7168  }
  0x14   :  { %789 = vset.pattern.permute.xlu0 %v844_v0  ;;  %39 = vst.msk [vmem:[#allocation3] sm:$0x3] %vm38_vm0, %v845_v1  ;;  %790 = vset.pattern.permute.xlu1 %v844_v0  ;;  %v42_v2 = vld [vmem:[%s979_s1] sm:$0xff]  ;;  %v43_v3 = vld [vmem:[%s979_s1 + $0x8] sm:$0xff]  ;;  %vm36_vm2 = vcmask 254976   ;;  %vm74_vm3 = vcmask 1041409  }
  0x15   :  { %46 = vperm.xlu0 %789, %v42_v2   ;;  %v82_v4 = vsel %vm81_vm1, %v42_v2, 0.0  ;;  %v89_v5 = vsel %vm81_vm1, %v43_v3, 0.0  ;;  %37 = vst.msk [vmem:[#allocation2] sm:$0x3] %vm36_vm2, %v845_v1  ;;  %v111_v21 = vld [vmem:[#allocation4] sm:$0xff]  ;;  %v112_v22 = vld [vmem:[#allocation4 + $0x8] sm:$0xff] }
  0x16   :  { %v83_v6 = vrot.slane %v82_v4, 4  ;;  %v90_v7 = vrot.slane %v89_v5, 4  ;;  %v113_v23 = vld [vmem:[#allocation4 + $0x10] sm:$0xff]  ;;  %v846_v24 = vmov 0.0|0.0   ;;  %v132_v25 = vand.u32 4294901760, %v111_v21  ;;  %v114_v27 = vld [vmem:[#allocation4 + $0x18] sm:$0xff] }
  0x17   :  { %753 = vmatprep.subr.bf16.mxu0 %v846_v24  ;;  %v135_v26 = vand.u32 4294901760, %v112_v22  ;;  %735 = vmatprep.subr.bf16.mxu1 %v846_v24  ;;  %v138_v28 = vand.u32 4294901760, %v113_v23  ;;  %v141_v29 = vand.u32 4294901760, %v114_v27  ;;  %vm847_vm4 = vmmov 0   ;;  %v40_v57 = vld [vmem:[%s978_s0] sm:$0xff]  ;;  %v41_v60 = vld [vmem:[%s978_s0 + $0x8] sm:$0xff] }
  0x18   :  { %v84_v8 = vadd.f32 %v83_v6, %v82_v4  ;;  %v91_v9 = vadd.f32 %v90_v7, %v89_v5  ;;  %710 = vmatprep.mubr.msk.f32.mxu0 %vm847_vm4, %v845_v1  ;;  %677 = vmatprep.mubr.msk.f32.mxu1 %vm847_vm4, %v845_v1  ;;  %v906_v31 = vsub.f32 %v111_v21, %v132_v25  ;;  %vm57_vm5 = vcmask 261120   ;;  %s848_s10 = smov [#allocation7]  }
  0x19   :  { %51 = vperm.xlu0 %789, %v43_v3   ;;  %v904_v30 = vpack.c.bf16 %v135_v26, %v132_v25  ;;  %v908_v32 = vsub.f32 %v112_v22, %v135_v26  ;;  %v910_v33 = vsub.f32 %v113_v23, %v138_v28  ;;  %v912_v34 = vsub.f32 %v114_v27, %v141_v29  ;;  %v638_v25 = vld [vmem:[%s981_s3] ss:$0 sm:$0xff]  ;;  %s629_s11 = sshll.u32 %s848_s10, 4  ;;  %s630_s11 = int_to_ptr.vmem [resolvable:$true] %s629_s11 }
  0x1a   :  { %v85_v10 = vrot.slane %v84_v8, 2  ;;  %v92_v11 = vrot.slane %v91_v9, 2  ;;  %v916_v35 = vpack.c.bf16 %v141_v29, %v138_v28  ;;  %v213_v36 = vand.u32 4294901760, %v906_v31  ;;  %s815_s12 = scalar_lea.vmem %s630_s11, 32  ;;  %p820_p9 = scmp.lt.s32.totalorder %s630_s11, %s630_s11 }
  0x1b   :  { %v80_v18 = vld [vmem:[#allocation3] sm:$0x3]  ;;  %755 = vmatpush3.bf16.msra.mxu0 %v904_v30  ;;  %737 = vmatpush3.bf16.msra.mxu1 %v904_v30  ;;  %v220_v37 = vand.u32 4294901760, %v908_v32  ;;  %v227_v43 = vand.u32 4294901760, %v910_v33  ;;  %v234_v44 = vand.u32 4294901760, %v912_v34  ;;  %v748_v52 = vpack.c.bf16 %v908_v32, %v906_v31  ;;  %p816_p8 = scmp.ne.s32.totalorder %s630_s11, %s815_s12  ;;  %p821_p10 = scmp.lt.s32.totalorder %s815_s12, %s815_s12 }
  0x1c   :  { %v86_v12 = vadd.f32 %v85_v10, %v84_v8  ;;  %v93_v13 = vadd.f32 %v92_v11, %v91_v9  ;;  %756 = vmatprep.subr.bf16.mxu0 %v846_v24  ;;  %738 = vmatprep.subr.bf16.mxu1 %v846_v24  ;;  %v214_v39 = vsub.f32 %v906_v31, %v213_v36 }
  0x1d   :  { %v760_v38 = vpack.c.bf16 %v220_v37, %v213_v36  ;;  %v221_v40 = vsub.f32 %v908_v32, %v220_v37  ;;  %v763_v46 = vpack.c.bf16 %v234_v44, %v227_v43  ;;  %v228_v47 = vsub.f32 %v910_v33, %v227_v43  ;;  %p822_p11 = por %p821_p10, %p820_p9 }
  0x1e   :  { %v87_v14 = vrot.slane %v86_v12, 1  ;;  %v94_v15 = vrot.slane %v93_v13, 1  ;;  %v215_v41 = vand.u32 4294901760, %v214_v39  ;;  %v235_v48 = vsub.f32 %v912_v34, %v234_v44 }
  0x1f   :  { %758 = vmatpush3.bf16.msra.mxu0 %v916_v35  ;;  %740 = vmatpush3.bf16.msra.mxu1 %v916_v35  ;;  %v222_v42 = vand.u32 4294901760, %v221_v40  ;;  %v229_v49 = vand.u32 4294901760, %v228_v47  ;;  %v751_v53 = vpack.c.bf16 %v912_v34, %v910_v33  ;;  %p823_p12 = pnand %p822_p11, %p816_p8 }
  0x20   :  { %v88_v16 = vadd.f32 %v87_v14, %v86_v12  ;;  %v95_v17 = vadd.f32 %v94_v15, %v93_v13  ;;  %759 = vmatprep.subr.bf16.mxu0 %v846_v24  ;;  %741 = vmatprep.subr.bf16.mxu1 %v846_v24  ;;  %v236_v50 = vand.u32 4294901760, %v235_v48  ;;  %v56_v13 = vld [vmem:[#allocation2] sm:$0x3] }
  0x21   :  { %v742_v45 = vpack.c.bf16 %v222_v42, %v215_v41 }
  0x22   :  { %v98_v19 = vsel %vm74_vm3, %v95_v17, %v88_v16  ;;  %v745_v51 = vpack.c.bf16 %v236_v50, %v229_v49 }
  0x23   :  { %v100_v20 = vadd.f32 %v98_v19, %v80_v18 }
  0x25   :  { %102 = vst.msk [vmem:[#allocation3] sm:$0x3] %vm38_vm0, %v100_v20 }
  0x2c   :  { %v106_v54 = vld [vmem:[#allocation3] sm:$0x3] }
  0x2d   :  { %124 = vperm.xlu1 %790, %v106_v54   ;;  %v107_v55 = vmax.f32 %v106_v54, 1e-09 }
  0x2f   :  { %791 = vrcp.f32 %v107_v55 }
  0x39   :  { %v792_v56 = vpop.eup %791 }
  0x3a   :  { %618 = vperm.xlu1 %790, %v792_v56  }
  0x94   :  { %v47_v58 = vpop.permute.xlu0 %46 }
  0x95   :  { %v54_v59 = vmul.f32 %v47_v58, %v40_v57 }
  0x97   :  { %v58_v61 = vsel %vm57_vm5, %v54_v59, 0.0 }
  0x98   :  { %v59_v62 = vrot.slane %v58_v61, 4  ;;  %v52_v63 = vpop.permute.xlu0 %51 }
  0x99   :  { %v55_v0 = vmul.f32 %v52_v63, %v41_v60 }
  0x9a   :  { %v60_v2 = vadd.f32 %v59_v62, %v58_v61 }
  0x9b   :  { %v65_v3 = vsel %vm57_vm5, %v55_v0, 0.0 }
  0x9c   :  { %v61_v4 = vrot.slane %v60_v2, 2  ;;  %v66_v5 = vrot.slane %v65_v3, 4 }
  0x9e   :  { %v62_v6 = vadd.f32 %v61_v4, %v60_v2  ;;  %v67_v7 = vadd.f32 %v66_v5, %v65_v3 }
  0xa0   :  { %v68_v8 = vrot.slane %v67_v7, 2  ;;  %v63_v9 = vrot.slane %v62_v6, 1 }
  0xa2   :  { %v69_v10 = vadd.f32 %v68_v8, %v67_v7  ;;  %v64_v12 = vadd.f32 %v63_v9, %v62_v6 }
  0xa4   :  { %v70_v11 = vrot.slane %v69_v10, 1 }
  0xa6   :  { %v71_v14 = vadd.f32 %v70_v11, %v69_v10 }
  0xa8   :  { %v75_v15 = vsel %vm74_vm3, %v71_v14, %v64_v12 }
  0xa9   :  { %v77_v16 = vadd.f32 %v75_v15, %v56_v13 }
  0xab   :  { %79 = vst.msk [vmem:[#allocation2] sm:$0x3] %vm36_vm2, %v77_v16 }
  0xac   :  { %v125_v26 = vpop.permute.xlu1 %124 }
  0xad   :  { %v127_v28 = vmul.f32 %v638_v25, %v125_v26 }
  0xb2   :  { %v110_v17 = vld [vmem:[#allocation2] sm:$0x3] }
  0xb3   :  { %v129_v18 = vsel %vm57_vm5, %v110_v17, 0 }
  0xb4   :  { %v200_v19 = vand.u32 4294901760, %v129_v18 }
  0xb6   :  { %v201_v20 = vsub.f32 %v129_v18, %v200_v19 }
  0xb8   :  { %v202_v21 = vand.u32 4294901760, %v201_v20 }
  0xb9   :  { %v619_v33 = vpop.permute.xlu1 %618 }
  0xba   :  { %711 = vmatmul.mubr.f32.vlgmr.msra.gmra.mrb[0].mxu0 %v202_v21  ;;  %v203_v22 = vsub.f32 %v201_v20, %v202_v21 }
  0xbb   :  { %761 = vmatpush3.bf16.msra.mxu0 %v760_v38  ;;  %721 = vmatprep.mubr.msk.f32.mxu0 %vm847_vm4, %v845_v1 }
  0xbc   :  { %v204_v23 = vand.u32 4294901760, %v203_v22  ;;  %762 = vmatprep.subr.bf16.mxu0 %v846_v24 }
  0xbe   :  { %678 = vmatmul.mubr.f32.vlgmr.msra.gmra.mrb[0].mxu1 %v204_v23 }
  0xbf   :  { %743 = vmatpush3.bf16.msra.mxu1 %v742_v45  ;;  %764 = vmatpush3.bf16.msra.mxu0 %v763_v46 }
  0xc0   :  { %744 = vmatprep.subr.bf16.mxu1 %v846_v24  ;;  %765 = vmatprep.subr.bf16.mxu0 %v846_v24 }
  0xc1   :  { %688 = vmatprep.mubr.msk.f32.mxu1 %vm847_vm4, %v845_v1 }
  0xc2   :  { %722 = vmatmul.mubr.f32.vlgmr.msra.gmra.mrb[0].mxu0 %v200_v19 }
  0xc3   :  { %746 = vmatpush3.bf16.msra.mxu1 %v745_v51  ;;  %767 = vmatpush3.bf16.msra.mxu0 %v904_v30 }
  0xc4   :  { %747 = vmatprep.subr.bf16.mxu1 %v846_v24  ;;  %768 = vmatprep.subr.bf16.mxu0 %v846_v24 }
  0xc5   :  { %732 = vmatprep.mubr.msk.f32.mxu0 %vm847_vm4, %v845_v1 }
  0xc6   :  { %689 = vmatmul.mubr.f32.vlgmr.msra.gmra.mrb[0].mxu1 %v200_v19 }
  0xc7   :  { %749 = vmatpush3.bf16.msra.mxu1 %v748_v52  ;;  %770 = vmatpush3.bf16.msra.mxu0 %v916_v35 }
  0xc8   :  { %750 = vmatprep.subr.bf16.mxu1 %v846_v24  ;;  %699 = vmatprep.mubr.msk.f32.mxu1 %vm847_vm4, %v845_v1 }
  0xca   :  { %733 = vmatmul.mubr.f32.vlgmr.msra.gmra.mrb[0].mxu0 %v200_v19 }
  0xcb   :  { %752 = vmatpush3.bf16.msra.mxu1 %v751_v53 }
  0xce   :  { %700 = vmatmul.mubr.f32.vlgmr.msra.gmra.mrb[0].mxu1 %v201_v20 }
 0x19d   :  { %v612_v27 = vpop.f32.mrb[0].mxu0 }
 0x19e   :  { %v734_v29 = vpop.f32.mrb[1].mxu0 }
 0x1a1   :  { %v377_v30 = vpop.f32.mrb[0].mxu1 }
 0x1a2   :  { %v771_v31 = vadd.f32 %v377_v30, %v127_v28  ;;  %v701_v32 = vpop.f32.mrb[1].mxu1 }
 0x1a4   :  { %v772_v24 = vadd.f32 %v771_v31, %v612_v27 }
 0x1a6   :  { %v621_v34 = vmul.f32 %v772_v24, %v619_v33 }
 0x1a8   :  { %622 = vst [vmem:[#allocation7] sm:$0x3] %v621_v34 }
 0x1a9   :  { %826 = shalt.err (!%p823_p12)
}
 0x1aa   :  { %s827_s14 = scalar_lea.hbm %s982_s4, 32 }
 0x1ab   :  { %p828_p13 = scmp.ne.s32.totalorder %s982_s4, %s827_s14  ;;  %p831_p0 = scmp.lt.u32.totalorder %s827_s14, %s982_s4 }
 0x1ad   :  { %p833_p1 = pnand %p831_p0, %p828_p13 }
 0x1af   :  { %836 = shalt.err (!%p833_p1)
}
 0x1b0   :  { %632 = dma.vmem_to_hbm [thread:$0]  %s630_s11, 32, %s982_s4, [#allocation6]  }
 0x1b1   :  { %839 = dma.done.wait [#allocation6], 32  }
 0x1b2   :  { %840 = vsyncadd [#allocation6], 4294967264 }
 0x1b3   :  { %636 = vsyncpa [#allocation5], 1 }
 0x1b4   :  { %637 = vsyncpa [#allocation6], 1 }

</bundles_post_ra>
